<compile_context>
chip_gen: v7x
topology: tpu7x:2x2x1
jax: 0.10.0
libtpu: 0.0.40
codegen_flags: <defaults>
</compile_context>

<pallas_src>
import jax
import jax.numpy as jnp
from jax.experimental import pallas as pl
from jax.experimental.pallas import tpu as pltpu


def _round_up(x, m):
    return (x + m - 1) // m * m


def _make_head_kernel(s_actual, ts, inv_s):
    """Builds the head kernel; s_actual / ts / inv_s are static (closed over)."""
    needs_mask = (s_actual % ts) != 0  # padded rows exist only if S % TS != 0

    def kernel(x_ref, wa_ref, wm_ref, b_ref, o_ref, sum_ref, max_ref):
        si = pl.program_id(1)

        @pl.when(si == 0)
        def _():
            sum_ref[...] = jnp.zeros_like(sum_ref)
            max_ref[...] = jnp.full_like(max_ref, -jnp.inf)

        x = x_ref[...].astype(jnp.float32)            # (TB, TS, H), upcast if bf16
        if needs_mask:
            row = si * ts + jax.lax.broadcasted_iota(jnp.int32, x.shape, 1)
            valid = row < s_actual
            x_sum = jnp.where(valid, x, 0.0)
            x_max = jnp.where(valid, x, -jnp.inf)
        else:
            x_sum = x
            x_max = x

        sum_ref[...] += jnp.sum(x_sum, axis=1)                     # (TB, H)
        max_ref[...] = jnp.maximum(max_ref[...], jnp.max(x_max, axis=1))

        # Finalize once per batch-tile: mean scale + tiny H->2 projection + bias,
        # single output store (dropout(p=0.3) is the identity at inference).
        @pl.when(si == pl.num_programs(1) - 1)
        def _():
            apool = sum_ref[...] * inv_s                           # (TB, H)
            mpool = max_ref[...]                                   # (TB, H)
            out = (jnp.dot(apool, wa_ref[...], preferred_element_type=jnp.float32)
                   + jnp.dot(mpool, wm_ref[...], preferred_element_type=jnp.float32)
                   + b_ref[...])                                   # (TB, 2)
            o_ref[...] = out.astype(o_ref.dtype)

    return kernel


def toxic_head(seq_x, w, b, *, ts=None, tb_max=8,
               vmem_block_budget=8 * 1024 * 1024):
    """seq_x: (B, S, H); w: (2, 2H) PyTorch-layout Linear weight; b: (2,)."""
    B, S, H = seq_x.shape
    itemsize = jnp.dtype(seq_x.dtype).itemsize

    # ---- tile selection -------------------------------------------------
    TB = B if B <= tb_max else tb_max
    B_pad = _round_up(B, TB)
    if ts is None:
        # Largest S tile (multiple of 8) such that two double-buffered input
        # blocks stay well under the scoped-VMEM default on every generation.
        max_rows = max(8, vmem_block_budget // (2 * TB * H * itemsize))
        TS = max(8, min(_round_up(S, 8), (max_rows // 8) * 8))
    else:
        TS = ts
    S_pad = _round_up(S, TS)

    if (B_pad, S_pad) != (B, S):
        seq_x = jnp.pad(seq_x, ((0, B_pad - B), (0, S_pad - S), (0, 0)))

    # Pre-split / transpose the Linear weight: concat+matmul -> two small matmuls.
    wa = jnp.transpose(w[:, :H]).astype(jnp.float32)   # (H, 2) acts on mean pool
    wm = jnp.transpose(w[:, H:]).astype(jnp.float32)   # (H, 2) acts on max pool
    b2 = b.reshape(1, 2).astype(jnp.float32)

    grid = (B_pad // TB, S_pad // TS)
    kernel = _make_head_kernel(S, TS, float(1.0 / S))

    cost = pl.CostEstimate(
        flops=int(2 * B * S * H + 2 * B * 2 * (2 * H)),
        transcendentals=0,
        bytes_accessed=int(B_pad * S_pad * H * itemsize
                           + 2 * H * 2 * 4 + 8 + B_pad * 2 * 4),
    )

    out = pl.pallas_call(
        kernel,
        out_shape=jax.ShapeDtypeStruct((B_pad, 2), jnp.float32),
        grid_spec=pltpu.PrefetchScalarGridSpec(
            num_scalar_prefetch=0,
            grid=grid,
            in_specs=[
                pl.BlockSpec((TB, TS, H), lambda bi, si: (bi, si, 0)),
                pl.BlockSpec((H, 2), lambda bi, si: (0, 0)),   # resident weights
                pl.BlockSpec((H, 2), lambda bi, si: (0, 0)),
                pl.BlockSpec((1, 2), lambda bi, si: (0, 0)),   # resident bias (VMEM)
            ],
            out_specs=pl.BlockSpec((TB, 2), lambda bi, si: (bi, 0)),
            scratch_shapes=[
                pltpu.VMEM((TB, H), jnp.float32),   # running sum
                pltpu.VMEM((TB, H), jnp.float32),   # running max
            ],
        ),
        compiler_params=pltpu.CompilerParams(
            dimension_semantics=("parallel", "arbitrary")),
        cost_estimate=cost,
    )(seq_x, wa, wm, b2)
    return out[:B]


def stub_backbone(input_ids, attention_masks, emb_table):
    # TODO(synk): the full XLMRoberta backbone (embeddings + transformer stack) is not
    # replicated; a deterministic embedding lookup (masked by attention_masks) stands
    # in for its sequence output so the head kernel has a (B, S, H) input.
    seq_x = emb_table[input_ids]                                   # (B, S, H)
    return seq_x * attention_masks[..., None].astype(seq_x.dtype)  # glue, plain JAX


def toxic_model_forward(input_ids, attention_masks, params, **head_kwargs):
    seq_x = stub_backbone(input_ids, attention_masks, params["emb"])
    return toxic_head(seq_x, params["linear_w"], params["linear_b"], **head_kwargs)


def _reference_head(seq_x, w, b):
    apool = jnp.mean(seq_x, axis=1)
    mpool = jnp.max(seq_x, axis=1)
    x = jnp.concatenate([apool, mpool], axis=1)
    return x @ w.T + b


if __name__ == "__main__":
    key = jax.random.PRNGKey(0)

    # ---- config 1: module-consistent small shapes (single-tile path) ----
    B, S, H, VOCAB = 2, 8, 32, 64
    k_emb, k_w, k_b, k_ids, k_mask = jax.random.split(key, 5)
    bound = 1.0 / jnp.sqrt(2.0 * H)
    params = {
        "emb": jax.random.normal(k_emb, (VOCAB, H), dtype=jnp.float32) * 0.02,
        "linear_w": jax.random.uniform(k_w, (2, 2 * H), minval=-bound, maxval=bound,
                                       dtype=jnp.float32),
        "linear_b": jax.random.uniform(k_b, (2,), minval=-bound, maxval=bound,
                                       dtype=jnp.float32),
    }
    input_ids = jax.random.randint(k_ids, (B, S), 0, VOCAB, dtype=jnp.int32)
    attention_masks = (jax.random.uniform(k_mask, (B, S)) > 0.2).astype(jnp.int32)

    out = toxic_model_forward(input_ids, attention_masks, params)
    out = jax.block_until_ready(out)
    seq_x = stub_backbone(input_ids, attention_masks, params["emb"])
    ref = _reference_head(seq_x, params["linear_w"], params["linear_b"])
    assert out.shape == (B, 2)
    assert jnp.allclose(out, ref, atol=1e-5, rtol=1e-5)

    # ---- config 2: exercises S-tiling, accumulation and padded-row masking ----
    B2, S2, H2 = 3, 20, 128
    k_emb2, k_w2, k_b2, k_ids2, k_mask2 = jax.random.split(jax.random.PRNGKey(1), 5)
    bound2 = 1.0 / jnp.sqrt(2.0 * H2)
    params2 = {
        "emb": jax.random.normal(k_emb2, (VOCAB, H2), dtype=jnp.float32) * 0.02,
        "linear_w": jax.random.uniform(k_w2, (2, 2 * H2), minval=-bound2, maxval=bound2,
                                       dtype=jnp.float32),
        "linear_b": jax.random.uniform(k_b2, (2,), minval=-bound2, maxval=bound2,
                                       dtype=jnp.float32),
    }
    input_ids2 = jax.random.randint(k_ids2, (B2, S2), 0, VOCAB, dtype=jnp.int32)
    attention_masks2 = (jax.random.uniform(k_mask2, (B2, S2)) > 0.2).astype(jnp.int32)

    out2 = toxic_model_forward(input_ids2, attention_masks2, params2, ts=8)
    out2 = jax.block_until_ready(out2)
    seq_x2 = stub_backbone(input_ids2, attention_masks2, params2["emb"])
    ref2 = _reference_head(seq_x2, params2["linear_w"], params2["linear_b"])
    assert out2.shape == (B2, 2)
    assert jnp.allclose(out2, ref2, atol=1e-5, rtol=1e-5)

    print("KERNEL_OK")
</pallas_src>

<mosaic_0001>
module attributes {stable_mosaic.version = 11 : i64} {
  func.func @kernel(%arg0: i32, %arg1: i32, %arg2: memref<2x8x32xf32, #tpu.memory_space<vmem>>, %arg3: memref<32x2xf32, #tpu.memory_space<vmem>>, %arg4: memref<32x2xf32, #tpu.memory_space<vmem>>, %arg5: memref<1x2xf32, #tpu.memory_space<vmem>>, %arg6: memref<2x2xf32, #tpu.memory_space<vmem>>, %arg7: memref<2x32xf32, #tpu.memory_space<vmem>>, %arg8: memref<2x32xf32, #tpu.memory_space<vmem>>) attributes {dimension_semantics = [#tpu.dimension_semantics<parallel>, #tpu.dimension_semantics<arbitrary>], iteration_bounds = array<i64: 1, 1>, scalar_prefetch = 0 : i64, scratch_operands = 2 : i64, tpu.core_type = #tpu.core_type<tc>, window_params = [{transform_indices = @transform_0, window_bounds = array<i64: 2, 8, 32>}, {pipeline_mode = #tpu.pipeline_mode<synchronous>, transform_indices = @transform_1, window_bounds = array<i64: 32, 2>}, {pipeline_mode = #tpu.pipeline_mode<synchronous>, transform_indices = @transform_2, window_bounds = array<i64: 32, 2>}, {pipeline_mode = #tpu.pipeline_mode<synchronous>, transform_indices = @transform_3, window_bounds = array<i64: 1, 2>}, {transform_indices = @transform_4, window_bounds = array<i64: 2, 2>}]} {
    %c0_i32 = arith.constant 0 : i32
    %0 = arith.cmpi eq, %arg1, %c0_i32 : i32
    %1 = arith.extui %0 : i1 to i32
    %c0_i32_0 = arith.constant 0 : i32
    %2 = arith.cmpi ne, %1, %c0_i32_0 : i32
    scf.if %2 {
      %cst_14 = arith.constant 0.000000e+00 : f32
      %15 = vector.broadcast %cst_14 : f32 to vector<2x32xf32>
      %c0_15 = arith.constant 0 : index
      %c0_16 = arith.constant 0 : index
      %16 = vector.load %arg7[%c0_15, %c0_16] : memref<2x32xf32, #tpu.memory_space<vmem>>, vector<2x32xf32>
      tpu.vector_store %arg7[%c0_15, %c0_16], %15 {strides = array<i32>} : memref<2x32xf32, #tpu.memory_space<vmem>>, vector<2x32xf32>,
      %cst_17 = arith.constant 0xFF800000 : f32
      %17 = vector.broadcast %cst_17 : f32 to vector<2x32xf32>
      %c0_18 = arith.constant 0 : index
      %c0_19 = arith.constant 0 : index
      %18 = vector.load %arg8[%c0_18, %c0_19] : memref<2x32xf32, #tpu.memory_space<vmem>>, vector<2x32xf32>
      tpu.vector_store %arg8[%c0_18, %c0_19], %17 {strides = array<i32>} : memref<2x32xf32, #tpu.memory_space<vmem>>, vector<2x32xf32>,
    } else {
    }
    %c0 = arith.constant 0 : index
    %c0_1 = arith.constant 0 : index
    %c0_2 = arith.constant 0 : index
    %3 = vector.load %arg2[%c0, %c0_1, %c0_2] : memref<2x8x32xf32, #tpu.memory_space<vmem>>, vector<2x8x32xf32>
    %c0_3 = arith.constant 0 : index
    %c0_4 = arith.constant 0 : index
    %4 = vector.load %arg7[%c0_3, %c0_4] : memref<2x32xf32, #tpu.memory_space<vmem>>, vector<2x32xf32>
    %cst = arith.constant dense<0.000000e+00> : vector<2x32xf32>
    %5 = vector.multi_reduction <add>, %3, %cst [1] : vector<2x8x32xf32> to vector<2x32xf32>
    %6 = arith.addf %4, %5 : vector<2x32xf32>
    %c0_5 = arith.constant 0 : index
    %c0_6 = arith.constant 0 : index
    %7 = vector.load %arg7[%c0_5, %c0_6] : memref<2x32xf32, #tpu.memory_space<vmem>>, vector<2x32xf32>
    tpu.vector_store %arg7[%c0_5, %c0_6], %6 {strides = array<i32>} : memref<2x32xf32, #tpu.memory_space<vmem>>, vector<2x32xf32>,
    %c0_7 = arith.constant 0 : index
    %c0_8 = arith.constant 0 : index
    %8 = vector.load %arg8[%c0_7, %c0_8] : memref<2x32xf32, #tpu.memory_space<vmem>>, vector<2x32xf32>
    %cst_9 = arith.constant dense<0xFF800000> : vector<2x32xf32>
    %9 = vector.multi_reduction <maximumf>, %3, %cst_9 [1] : vector<2x8x32xf32> to vector<2x32xf32>
    %10 = arith.maximumf %8, %9 : vector<2x32xf32>
    %c0_10 = arith.constant 0 : index
    %c0_11 = arith.constant 0 : index
    %11 = vector.load %arg8[%c0_10, %c0_11] : memref<2x32xf32, #tpu.memory_space<vmem>>, vector<2x32xf32>
    tpu.vector_store %arg8[%c0_10, %c0_11], %10 {strides = array<i32>} : memref<2x32xf32, #tpu.memory_space<vmem>>, vector<2x32xf32>,
    %c0_i32_12 = arith.constant 0 : i32
    %12 = arith.cmpi eq, %arg1, %c0_i32_12 : i32
    %13 = arith.extui %12 : i1 to i32
    %c0_i32_13 = arith.constant 0 : i32
    %14 = arith.cmpi ne, %13, %c0_i32_13 : i32
    scf.if %14 {
      %c0_14 = arith.constant 0 : index
      %c0_15 = arith.constant 0 : index
      %15 = vector.load %arg7[%c0_14, %c0_15] : memref<2x32xf32, #tpu.memory_space<vmem>>, vector<2x32xf32>
      %cst_16 = arith.constant 1.250000e-01 : f32
      %16 = vector.broadcast %cst_16 : f32 to vector<2x32xf32>
      %17 = arith.mulf %15, %16 : vector<2x32xf32>
      %c0_17 = arith.constant 0 : index
      %c0_18 = arith.constant 0 : index
      %18 = vector.load %arg8[%c0_17, %c0_18] : memref<2x32xf32, #tpu.memory_space<vmem>>, vector<2x32xf32>
      %c0_19 = arith.constant 0 : index
      %c0_20 = arith.constant 0 : index
      %19 = vector.load %arg3[%c0_19, %c0_20] : memref<32x2xf32, #tpu.memory_space<vmem>>, vector<32x2xf32>
      %cst_21 = arith.constant dense<0.000000e+00> : vector<2x2xf32>
      %20 = tpu.matmul %17, %19, %cst_21 {dimension_numbers = #tpu.dot_dimension_numbers<[1], [0], [0], [1], [0, 0, 1, 1], [], []>} : vector<2x32xf32>, vector<32x2xf32>, vector<2x2xf32> -> vector<2x2xf32>
      %c0_22 = arith.constant 0 : index
      %c0_23 = arith.constant 0 : index
      %21 = vector.load %arg4[%c0_22, %c0_23] : memref<32x2xf32, #tpu.memory_space<vmem>>, vector<32x2xf32>
      %cst_24 = arith.constant dense<0.000000e+00> : vector<2x2xf32>
      %22 = tpu.matmul %18, %21, %cst_24 {dimension_numbers = #tpu.dot_dimension_numbers<[1], [0], [0], [1], [0, 0, 1, 1], [], []>} : vector<2x32xf32>, vector<32x2xf32>, vector<2x2xf32> -> vector<2x2xf32>
      %23 = arith.addf %20, %22 : vector<2x2xf32>
      %c0_25 = arith.constant 0 : index
      %c0_26 = arith.constant 0 : index
      %24 = vector.load %arg5[%c0_25, %c0_26] : memref<1x2xf32, #tpu.memory_space<vmem>>, vector<1x2xf32>
      %25 = vector.broadcast %24 : vector<1x2xf32> to vector<2x2xf32>
      %26 = arith.addf %23, %25 : vector<2x2xf32>
      %c0_27 = arith.constant 0 : index
      %c0_28 = arith.constant 0 : index
      %27 = vector.load %arg6[%c0_27, %c0_28] : memref<2x2xf32, #tpu.memory_space<vmem>>, vector<2x2xf32>
      tpu.vector_store %arg6[%c0_27, %c0_28], %26 {strides = array<i32>} : memref<2x2xf32, #tpu.memory_space<vmem>>, vector<2x2xf32>,
    } else {
    }
    return
  }
  func.func @transform_0(%arg0: i32, %arg1: i32) -> (i32, i32, i32) {
    %c0_i32 = arith.constant 0 : i32
    %c0_i32_0 = arith.constant 0 : i32
    return %arg0, %arg1, %c0_i32 : i32, i32, i32
  }
  func.func @transform_1(%arg0: i32, %arg1: i32) -> (i32, i32) {
    %c0_i32 = arith.constant 0 : i32
    %c0_i32_0 = arith.constant 0 : i32
    %c0_i32_1 = arith.constant 0 : i32
    return %c0_i32, %c0_i32_0 : i32, i32
  }
  func.func @transform_2(%arg0: i32, %arg1: i32) -> (i32, i32) {
    %c0_i32 = arith.constant 0 : i32
    %c0_i32_0 = arith.constant 0 : i32
    %c0_i32_1 = arith.constant 0 : i32
    return %c0_i32, %c0_i32_0 : i32, i32
  }
  func.func @transform_3(%arg0: i32, %arg1: i32) -> (i32, i32) {
    %c0_i32 = arith.constant 0 : i32
    %c0_i32_0 = arith.constant 0 : i32
    %c0_i32_1 = arith.constant 0 : i32
    return %c0_i32, %c0_i32_0 : i32, i32
  }
  func.func @transform_4(%arg0: i32, %arg1: i32) -> (i32, i32) {
    %c0_i32 = arith.constant 0 : i32
    %c0_i32_0 = arith.constant 0 : i32
    return %arg0, %c0_i32 : i32, i32
  }
}

</mosaic_0001>

<bundles_post_ra>
// kernel: tpu_custom_call.1
= control target key start
LH: loop header
LB: loop body
LE: loop exit
PB: predicated region body
PF: predicated region fallthrough
CT: control target
= control target key end

     0   :  { %vm22_vm0 = vcmask 254976   ;;  %v332_v3 = vmov 0.0|0.0   ;;  %v333_v8 = vmov 0.0   ;;  %vm28_vm1 = vcmask 261120   ;;  %s417_s0 = inlined_call_operand.vmem [shape: f32[2,8,32], index: 0, kind: input, shape index: {}]   ;;  %s418_s1 = inlined_call_operand.vmem [shape: f32[32,2], index: 1, kind: input, shape index: {}]   ;;  %s419_s2 = inlined_call_operand.vmem [shape: f32[32,2], index: 2, kind: input, shape index: {}]   ;;  %s420_s3 = inlined_call_operand.vmem [shape: f32[1,2], index: 3, kind: input, shape index: {}]   ;;  %s421_s4 = inlined_call_operand.hbm [shape: f32[2,2], index: 4, kind: output, shape index: {}]  }
   0x1   :  { %v82_v0 = vld [vmem:[%s419_s2] sm:$0xff]  ;;  %v83_v1 = vld [vmem:[%s419_s2 + $0x8] sm:$0xff]  ;;  %291 = vmatprep.subr.bf16.mxu0 %v332_v3  ;;  %297 = vmatprep.subr.bf16.mxu1 %v332_v3  ;;  %v84_v6 = vld [vmem:[%s419_s2 + $0x10] sm:$0xff]  ;;  %23 = vst.msk [vmem:[#allocation2] sm:$0x3] %vm22_vm0, %v333_v8  ;;  %v334_v12 = vmov -inf  }
   0x2   :  { %v78_v2 = vld [vmem:[%s418_s1] sm:$0xff]  ;;  %v292_v4 = vpack.c.bf16 %v83_v1, %v82_v0  ;;  %v79_v5 = vld [vmem:[%s418_s1 + $0x8] sm:$0xff]  ;;  %v85_v7 = vld [vmem:[%s419_s2 + $0x18] sm:$0xff]  ;;  %24 = vst.msk [vmem:[#allocation3] sm:$0x3] %vm22_vm0, %v334_v12  ;;  %vm335_vm2 = vmmov 0  }
   0x3   :  { %v298_v9 = vpack.c.bf16 %v79_v5, %v78_v2  ;;  %v80_v10 = vld [vmem:[%s418_s1 + $0x10] sm:$0xff]  ;;  %v81_v11 = vld [vmem:[%s418_s1 + $0x18] sm:$0xff]  ;;  %v25_v13 = vld [vmem:[%s417_s0] sm:$0xff]  ;;  %v295_v14 = vpack.c.bf16 %v85_v7, %v84_v6  ;;  %277 = vmatprep.mubr.msk.f32.mxu0 %vm335_vm2, %v333_v8 }
   0x4   :  { %293 = vmatpush3.bf16.msra.mxu0 %v292_v4  ;;  %v301_v15 = vpack.c.bf16 %v81_v11, %v80_v10  ;;  %v26_v16 = vld [vmem:[%s417_s0 + $0x8] sm:$0xff]  ;;  %v29_v17 = vsel %vm28_vm1, %v25_v13, 0.0  ;;  %v52_v18 = vsel %vm28_vm1, %v25_v13, -inf }
   0x5   :  { %9 = vsyncpa [#allocation5], 0  ;;  %299 = vmatpush3.bf16.msra.mxu1 %v298_v9  ;;  %294 = vmatprep.subr.bf16.mxu0 %v332_v3  ;;  %v30_v19 = vrot.slane %v29_v17, 4  ;;  %v36_v20 = vsel %vm28_vm1, %v26_v16, 0.0  ;;  %v53_v21 = vrot.slane %v52_v18, 4  ;;  %v59_v22 = vsel %vm28_vm1, %v26_v16, -inf }
   0x6   :  { %300 = vmatprep.subr.bf16.mxu1 %v332_v3  ;;  %v37_v23 = vrot.slane %v36_v20, 4  ;;  %v60_v24 = vrot.slane %v59_v22, 4  ;;  %288 = vmatprep.mubr.msk.f32.mxu1 %vm335_vm2, %v333_v8  ;;  %vm45_vm3 = vcmask 1041409   ;;  %v258_v57 = vld [vmem:[%s420_s3] ss:$0 sm:$0xff]  ;;  %s336_s8 = smov [#allocation4]  }
   0x7   :  { %v31_v25 = vadd.f32 %v30_v19, %v29_v17  ;;  %v54_v26 = vmax.f32 %v52_v18, %v53_v21  ;;  %s248_s9 = sshll.u32 %s336_s8, 4  ;;  %vm240_vm4 = vcmask 9216   ;;  %s249_s9 = int_to_ptr.vmem [resolvable:$true] %s248_s9 }
   0x8   :  { %296 = vmatpush3.bf16.msra.mxu0 %v295_v14  ;;  %v38_v27 = vadd.f32 %v37_v23, %v36_v20  ;;  %v61_v28 = vmax.f32 %v59_v22, %v60_v24  ;;  %v27_v43 = vld [vmem:[#allocation2] sm:$0x3]  ;;  %s308_s10 = scalar_lea.vmem %s249_s9, 32  ;;  %p313_p1 = scmp.lt.s32.totalorder %s249_s9, %s249_s9 }
   0x9   :  { %302 = vmatpush3.bf16.msra.mxu1 %v301_v15  ;;  %v32_v29 = vrot.slane %v31_v25, 2  ;;  %v55_v30 = vrot.slane %v54_v26, 2  ;;  %v51_v45 = vld [vmem:[#allocation3] sm:$0x3]  ;;  %p309_p0 = scmp.ne.s32.totalorder %s249_s9, %s308_s10  ;;  %p314_p2 = scmp.lt.s32.totalorder %s308_s10, %s308_s10 }
   0xa   :  { %v39_v31 = vrot.slane %v38_v27, 2  ;;  %v62_v32 = vrot.slane %v61_v28, 2 }
   0xb   :  { %v33_v33 = vadd.f32 %v32_v29, %v31_v25  ;;  %v56_v34 = vmax.f32 %v54_v26, %v55_v30  ;;  %p315_p3 = por %p314_p2, %p313_p1 }
   0xc   :  { %v40_v35 = vadd.f32 %v39_v31, %v38_v27  ;;  %v63_v36 = vmax.f32 %v61_v28, %v62_v32 }
   0xd   :  { %v34_v37 = vrot.slane %v33_v33, 1  ;;  %v57_v38 = vrot.slane %v56_v34, 1  ;;  %p316_p4 = pnand %p315_p3, %p309_p0 }
   0xe   :  { %v41_v39 = vrot.slane %v40_v35, 1  ;;  %v64_v40 = vrot.slane %v63_v36, 1 }
   0xf   :  { %v35_v41 = vadd.f32 %v34_v37, %v33_v33  ;;  %v58_v42 = vmax.f32 %v56_v34, %v57_v38 }
  0x10   :  { %v42_v44 = vadd.f32 %v41_v39, %v40_v35  ;;  %v65_v46 = vmax.f32 %v63_v36, %v64_v40 }
  0x12   :  { %v46_v47 = vsel %vm45_vm3, %v42_v44, %v35_v41  ;;  %v68_v48 = vsel %vm45_vm3, %v65_v46, %v58_v42 }
  0x13   :  { %v48_v49 = vadd.f32 %v46_v47, %v27_v43  ;;  %v70_v50 = vmax.f32 %v51_v45, %v68_v48 }
  0x15   :  { %50 = vst.msk [vmem:[#allocation2] sm:$0x3] %vm22_vm0, %v48_v49  ;;  %71 = vst.msk [vmem:[#allocation3] sm:$0x3] %vm22_vm0, %v70_v50 }
  0x1c   :  { %v77_v51 = vld [vmem:[#allocation3] sm:$0x3]  ;;  %v75_v52 = vld [vmem:[#allocation2] sm:$0x3] }
  0x1d   :  { %278 = vmatmul.mubr.msk.f32.vlgmr.msra.gmra.mrb[0].mxu0 %vm28_vm1, %v77_v51  ;;  %v76_v53 = vmul.f32 0.125, %v75_v52 }
  0x1f   :  { %289 = vmatmul.mubr.msk.f32.vlgmr.msra.gmra.mrb[0].mxu1 %vm28_vm1, %v76_v53 }
  0xf0   :  { %v155_v54 = vpop.f32.mrb[0].mxu0 }
  0xf1   :  { %v279_v55 = vpop.f32.mrb[1].mxu0 }
  0xf2   :  { %v228_v56 = vpop.f32.mrb[0].mxu1 }
  0xf3   :  { %v229_v58 = vadd.f32 %v228_v56, %v155_v54  ;;  %v290_v59 = vpop.f32.mrb[1].mxu1 }
  0xf5   :  { %v239_v60 = vadd.f32 %v258_v57, %v229_v58 }
  0xf7   :  { %241 = vst.msk [vmem:[#allocation4] sm:$0x3] %vm240_vm4, %v239_v60 }
  0xf8   :  { %319 = shalt.err (!%p316_p4)
}
  0xf9   :  { %s320_s13 = scalar_lea.hbm %s421_s4, 32 }
  0xfa   :  { %p321_p5 = scmp.ne.s32.totalorder %s421_s4, %s320_s13  ;;  %p324_p6 = scmp.lt.u32.totalorder %s320_s13, %s421_s4 }
  0xfc   :  { %p326_p7 = pnand %p324_p6, %p321_p5 }
  0xfe   :  { %329 = shalt.err (!%p326_p7)
}
  0xff   :  { %251 = dma.vmem_to_hbm [thread:$0]  %s249_s9, 32, %s421_s4, [#allocation5]  }
 0x100   :  { %330 = dma.done.wait [#allocation5], 32  }
 0x101   :  { %331 = vsyncadd [#allocation5], 4294967264 }
 0x102   :  { %255 = vsyncpa [#allocation5], 1 }

</bundles_post_ra>
